<compile_context>
chip_gen: v6e
topology: v6e:2x2x1
jax: 0.10.0
libtpu: 0.0.40
codegen_flags: <defaults>
</compile_context>

<pallas_src>
import functools

import jax
import jax.numpy as jnp
from jax.experimental import pallas as pl
from jax.experimental.pallas import tpu as pltpu

_LANE = 128          # TPU lane width
_ROW_BUDGET = 4096   # rows of 128 lanes per block (f32: 6 MiB input tile,
                     # ~32 MiB total double-buffered working set)


def _rgb2ycrcb_kernel(x_ref, y_ref, cr_ref, cb_ref, *, offset):
    # x_ref: (Bt, 3, TP, 128); y/cr/cb refs: (Bt, TP, 128) (channel squeezed)
    x = x_ref[...]
    r = x[:, 0]
    g = x[:, 1]
    b = x[:, 2]

    y = 0.299 * r + 0.587 * g + 0.114 * b
    cr = (r - y) * 0.713 + offset
    cb = (b - y) * 0.5256 + offset

    y_ref[...] = jnp.clip(y, 0.0, 1.0).astype(y_ref.dtype)
    cr_ref[...] = jnp.clip(cr, 0.0, 1.0).astype(cr_ref.dtype)
    cb_ref[...] = jnp.clip(cb, 0.0, 1.0).astype(cb_ref.dtype)


def rgb2ycrcb(x, offset=0.5):
    """x: (N, 3, H, W) float array -> (Y, Cr, Cb), each (N, 1, H, W)."""
    n, c, h, w = x.shape
    assert c == 3, "RGB2YCrCb expects 3 input channels"
    dtype = x.dtype
    itemsize = jnp.dtype(dtype).itemsize
    L = h * w

    # ---- tiling choice -----------------------------------------------------
    p_raw = -(-L // _LANE)                       # ceil(H*W / 128)
    if p_raw <= _ROW_BUDGET:
        tp = p_raw                               # full spatial extent per block
        gp = 1
        bt_max = max(1, _ROW_BUDGET // p_raw)    # batch small images per block
        bt = max(d for d in range(1, n + 1) if n % d == 0 and d <= bt_max)
    else:
        tp = _ROW_BUDGET                         # multiple of 8 (sublane rule)
        gp = -(-p_raw // tp)
        bt = 1
    p = gp * tp
    l_pad = p * _LANE
    gn = n // bt

    # ---- lane-dense layout: (N,3,H,W) -> (N,3,P,128) -------------------------
    x_flat = x.reshape(n, 3, L)
    if l_pad != L:
        x_flat = jnp.pad(x_flat, ((0, 0), (0, 0), (0, l_pad - L)))
    x4 = x_flat.reshape(n, 3, p, _LANE)

    out_shape = jax.ShapeDtypeStruct((n, 1, p, _LANE), dtype)
    in_spec = pl.BlockSpec((bt, 3, tp, _LANE), lambda i, j: (i, 0, j, 0))
    out_spec = pl.BlockSpec((bt, None, tp, _LANE), lambda i, j: (i, 0, j, 0))

    # VMEM budget: double-buffered input (3 planes) + 3 outputs + headroom.
    tile_bytes = bt * tp * _LANE * itemsize
    vmem_limit = max(2 * 6 * tile_bytes + (8 << 20), 16 << 20)

    cost = pl.CostEstimate(
        flops=10 * n * L,                 # ~10 VPU ops per pixel
        transcendentals=0,
        bytes_accessed=6 * n * L * itemsize,   # read 3 planes, write 3 planes
    )

    kernel = functools.partial(_rgb2ycrcb_kernel, offset=float(offset))

    y4, cr4, cb4 = pl.pallas_call(
        kernel,
        out_shape=(out_shape, out_shape, out_shape),
        grid_spec=pltpu.PrefetchScalarGridSpec(
            num_scalar_prefetch=0,
            grid=(gn, gp),
            in_specs=[in_spec],
            out_specs=[out_spec, out_spec, out_spec],
        ),
        compiler_params=pltpu.CompilerParams(
            dimension_semantics=("parallel", "parallel"),
            vmem_limit_bytes=vmem_limit,
        ),
        cost_estimate=cost,
    )(x4)

    def _unflatten(a):
        a = a.reshape(n, 1, l_pad)
        if l_pad != L:
            a = a[:, :, :L]
        return a.reshape(n, 1, h, w)

    return _unflatten(y4), _unflatten(cr4), _unflatten(cb4)


def _reference(x, offset=0.5):
    r = x[:, 0:1, :, :]
    g = x[:, 1:2, :, :]
    b = x[:, 2:3, :, :]
    y = 0.299 * r + 0.587 * g + 0.114 * b
    cr = (r - y) * 0.713 + offset
    cb = (b - y) * 0.5256 + offset
    return (jnp.clip(y, 0.0, 1.0), jnp.clip(cr, 0.0, 1.0), jnp.clip(cb, 0.0, 1.0))


if __name__ == "__main__":
    key = jax.random.PRNGKey(0)
    x = jax.random.uniform(key, (2, 3, 16, 16), dtype=jnp.float32)

    y, cr, cb = rgb2ycrcb(x, offset=0.5)
    jax.block_until_ready((y, cr, cb))

    y_ref, cr_ref, cb_ref = _reference(x, offset=0.5)
    assert y.shape == (2, 1, 16, 16) and cr.shape == y.shape and cb.shape == y.shape
    assert jnp.allclose(y, y_ref, atol=1e-6)
    assert jnp.allclose(cr, cr_ref, atol=1e-6)
    assert jnp.allclose(cb, cb_ref, atol=1e-6)

    # exercise the lane-padding path (H*W not a multiple of 128)
    x2 = jax.random.uniform(jax.random.PRNGKey(1), (2, 3, 17, 19), dtype=jnp.float32)
    y2, cr2, cb2 = rgb2ycrcb(x2, offset=0.5)
    jax.block_until_ready((y2, cr2, cb2))
    y2r, cr2r, cb2r = _reference(x2, offset=0.5)
    assert y2.shape == (2, 1, 17, 19)
    assert jnp.allclose(y2, y2r, atol=1e-6)
    assert jnp.allclose(cr2, cr2r, atol=1e-6)
    assert jnp.allclose(cb2, cb2r, atol=1e-6)

    print("KERNEL_OK")
</pallas_src>

<mosaic_0001>
module attributes {stable_mosaic.version = 11 : i64} {
  func.func @_rgb2ycrcb_kernel(%arg0: i32, %arg1: i32, %arg2: memref<2x3x2x128xf32, #tpu.memory_space<vmem>>, %arg3: memref<2x1x2x128xf32, #tpu.memory_space<vmem>>, %arg4: memref<2x1x2x128xf32, #tpu.memory_space<vmem>>, %arg5: memref<2x1x2x128xf32, #tpu.memory_space<vmem>>) attributes {dimension_semantics = [#tpu.dimension_semantics<parallel>, #tpu.dimension_semantics<parallel>], iteration_bounds = array<i64: 1, 1>, scalar_prefetch = 0 : i64, scratch_operands = 0 : i64, tpu.core_type = #tpu.core_type<tc>, window_params = [{transform_indices = @transform_0, window_bounds = array<i64: 2, 3, 2, 128>}, {transform_indices = @transform_1, window_bounds = array<i64: 2, 1, 2, 128>}, {transform_indices = @transform_2, window_bounds = array<i64: 2, 1, 2, 128>}, {transform_indices = @transform_3, window_bounds = array<i64: 2, 1, 2, 128>}]} {
    %c0 = arith.constant 0 : index
    %c0_0 = arith.constant 0 : index
    %c0_1 = arith.constant 0 : index
    %c0_2 = arith.constant 0 : index
    %0 = vector.load %arg2[%c0, %c0_0, %c0_1, %c0_2] : memref<2x3x2x128xf32, #tpu.memory_space<vmem>>, vector<2x3x2x128xf32>
    %1 = vector.extract_strided_slice %0 {offsets = [0, 0, 0, 0], sizes = [2, 1, 2, 128], strides = [1, 1, 1, 1]} : vector<2x3x2x128xf32> to vector<2x1x2x128xf32>
    %2 = vector.shape_cast %1 : vector<2x1x2x128xf32> to vector<2x2x128xf32>
    %3 = vector.extract_strided_slice %0 {offsets = [0, 1, 0, 0], sizes = [2, 1, 2, 128], strides = [1, 1, 1, 1]} : vector<2x3x2x128xf32> to vector<2x1x2x128xf32>
    %4 = vector.shape_cast %3 : vector<2x1x2x128xf32> to vector<2x2x128xf32>
    %5 = vector.extract_strided_slice %0 {offsets = [0, 2, 0, 0], sizes = [2, 1, 2, 128], strides = [1, 1, 1, 1]} : vector<2x3x2x128xf32> to vector<2x1x2x128xf32>
    %6 = vector.shape_cast %5 : vector<2x1x2x128xf32> to vector<2x2x128xf32>
    %cst = arith.constant 2.990000e-01 : f32
    %7 = vector.broadcast %cst : f32 to vector<2x2x128xf32>
    %8 = arith.mulf %7, %2 : vector<2x2x128xf32>
    %cst_3 = arith.constant 5.870000e-01 : f32
    %9 = vector.broadcast %cst_3 : f32 to vector<2x2x128xf32>
    %10 = arith.mulf %9, %4 : vector<2x2x128xf32>
    %11 = arith.addf %8, %10 : vector<2x2x128xf32>
    %cst_4 = arith.constant 1.140000e-01 : f32
    %12 = vector.broadcast %cst_4 : f32 to vector<2x2x128xf32>
    %13 = arith.mulf %12, %6 : vector<2x2x128xf32>
    %14 = arith.addf %11, %13 : vector<2x2x128xf32>
    %15 = arith.subf %2, %14 : vector<2x2x128xf32>
    %cst_5 = arith.constant 0.712999999 : f32
    %16 = vector.broadcast %cst_5 : f32 to vector<2x2x128xf32>
    %17 = arith.mulf %15, %16 : vector<2x2x128xf32>
    %cst_6 = arith.constant 5.000000e-01 : f32
    %18 = vector.broadcast %cst_6 : f32 to vector<2x2x128xf32>
    %19 = arith.addf %17, %18 : vector<2x2x128xf32>
    %20 = arith.subf %6, %14 : vector<2x2x128xf32>
    %cst_7 = arith.constant 5.256000e-01 : f32
    %21 = vector.broadcast %cst_7 : f32 to vector<2x2x128xf32>
    %22 = arith.mulf %20, %21 : vector<2x2x128xf32>
    %cst_8 = arith.constant 5.000000e-01 : f32
    %23 = vector.broadcast %cst_8 : f32 to vector<2x2x128xf32>
    %24 = arith.addf %22, %23 : vector<2x2x128xf32>
    %cst_9 = arith.constant 0.000000e+00 : f32
    %cst_10 = arith.constant 1.000000e+00 : f32
    %25 = vector.broadcast %cst_9 : f32 to vector<2x2x128xf32>
    %26 = arith.maximumf %25, %14 : vector<2x2x128xf32>
    %27 = vector.broadcast %cst_10 : f32 to vector<2x2x128xf32>
    %28 = arith.minimumf %27, %26 : vector<2x2x128xf32>
    %c0_11 = arith.constant 0 : index
    %c0_12 = arith.constant 0 : index
    %c0_13 = arith.constant 0 : index
    %c0_14 = arith.constant 0 : index
    %29 = vector.load %arg3[%c0_11, %c0_12, %c0_13, %c0_14] : memref<2x1x2x128xf32, #tpu.memory_space<vmem>>, vector<2x1x2x128xf32>
    %30 = vector.shape_cast %29 : vector<2x1x2x128xf32> to vector<2x2x128xf32>
    %31 = vector.shape_cast %28 : vector<2x2x128xf32> to vector<2x1x2x128xf32>
    tpu.vector_store %arg3[%c0_11, %c0_12, %c0_13, %c0_14], %31 {strides = array<i32>} : memref<2x1x2x128xf32, #tpu.memory_space<vmem>>, vector<2x1x2x128xf32>,
    %cst_15 = arith.constant 0.000000e+00 : f32
    %cst_16 = arith.constant 1.000000e+00 : f32
    %32 = vector.broadcast %cst_15 : f32 to vector<2x2x128xf32>
    %33 = arith.maximumf %32, %19 : vector<2x2x128xf32>
    %34 = vector.broadcast %cst_16 : f32 to vector<2x2x128xf32>
    %35 = arith.minimumf %34, %33 : vector<2x2x128xf32>
    %c0_17 = arith.constant 0 : index
    %c0_18 = arith.constant 0 : index
    %c0_19 = arith.constant 0 : index
    %c0_20 = arith.constant 0 : index
    %36 = vector.load %arg4[%c0_17, %c0_18, %c0_19, %c0_20] : memref<2x1x2x128xf32, #tpu.memory_space<vmem>>, vector<2x1x2x128xf32>
    %37 = vector.shape_cast %36 : vector<2x1x2x128xf32> to vector<2x2x128xf32>
    %38 = vector.shape_cast %35 : vector<2x2x128xf32> to vector<2x1x2x128xf32>
    tpu.vector_store %arg4[%c0_17, %c0_18, %c0_19, %c0_20], %38 {strides = array<i32>} : memref<2x1x2x128xf32, #tpu.memory_space<vmem>>, vector<2x1x2x128xf32>,
    %cst_21 = arith.constant 0.000000e+00 : f32
    %cst_22 = arith.constant 1.000000e+00 : f32
    %39 = vector.broadcast %cst_21 : f32 to vector<2x2x128xf32>
    %40 = arith.maximumf %39, %24 : vector<2x2x128xf32>
    %41 = vector.broadcast %cst_22 : f32 to vector<2x2x128xf32>
    %42 = arith.minimumf %41, %40 : vector<2x2x128xf32>
    %c0_23 = arith.constant 0 : index
    %c0_24 = arith.constant 0 : index
    %c0_25 = arith.constant 0 : index
    %c0_26 = arith.constant 0 : index
    %43 = vector.load %arg5[%c0_23, %c0_24, %c0_25, %c0_26] : memref<2x1x2x128xf32, #tpu.memory_space<vmem>>, vector<2x1x2x128xf32>
    %44 = vector.shape_cast %43 : vector<2x1x2x128xf32> to vector<2x2x128xf32>
    %45 = vector.shape_cast %42 : vector<2x2x128xf32> to vector<2x1x2x128xf32>
    tpu.vector_store %arg5[%c0_23, %c0_24, %c0_25, %c0_26], %45 {strides = array<i32>} : memref<2x1x2x128xf32, #tpu.memory_space<vmem>>, vector<2x1x2x128xf32>,
    return
  }
  func.func @transform_0(%arg0: i32, %arg1: i32) -> (i32, i32, i32, i32) {
    %c0_i32 = arith.constant 0 : i32
    %c0_i32_0 = arith.constant 0 : i32
    %c0_i32_1 = arith.constant 0 : i32
    return %arg0, %c0_i32, %arg1, %c0_i32_0 : i32, i32, i32, i32
  }
  func.func @transform_1(%arg0: i32, %arg1: i32) -> (i32, i32, i32, i32) {
    %c0_i32 = arith.constant 0 : i32
    %c0_i32_0 = arith.constant 0 : i32
    %c0_i32_1 = arith.constant 0 : i32
    return %arg0, %c0_i32, %arg1, %c0_i32_0 : i32, i32, i32, i32
  }
  func.func @transform_2(%arg0: i32, %arg1: i32) -> (i32, i32, i32, i32) {
    %c0_i32 = arith.constant 0 : i32
    %c0_i32_0 = arith.constant 0 : i32
    %c0_i32_1 = arith.constant 0 : i32
    return %arg0, %c0_i32, %arg1, %c0_i32_0 : i32, i32, i32, i32
  }
  func.func @transform_3(%arg0: i32, %arg1: i32) -> (i32, i32, i32, i32) {
    %c0_i32 = arith.constant 0 : i32
    %c0_i32_0 = arith.constant 0 : i32
    %c0_i32_1 = arith.constant 0 : i32
    return %arg0, %c0_i32, %arg1, %c0_i32_0 : i32, i32, i32, i32
  }
}

</mosaic_0001>

<bundles_post_ra>
// kernel: tpu_custom_call.1
= control target key start
LH: loop header
LB: loop body
LE: loop exit
PB: predicated region body
PF: predicated region fallthrough
CT: control target
= control target key end

     0   :  { %9 = vsyncpa [#allocation3], 0  ;;  %s263_s0 = inlined_call_operand.hbm [shape: f32[2,3,2,128], index: 0, kind: input, shape index: {}]   ;;  %s264_s1 = inlined_call_operand.hbm [shape: f32[2,1,2,128], index: 1, kind: output, shape index: {0}]   ;;  %s265_s2 = inlined_call_operand.hbm [shape: f32[2,1,2,128], index: 2, kind: output, shape index: {1}]   ;;  %s266_s3 = inlined_call_operand.hbm [shape: f32[2,1,2,128], index: 3, kind: output, shape index: {2}]  }
   0x1   :  { %10 = vsyncpa [#allocation4], 0 }
   0x2   :  { %11 = vsyncpa [#allocation7], 0  ;;  %s213_s12 = smov [#allocation2]  }
   0x3   :  { %s17_s13 = sshll.u32 %s213_s12, 4  ;;  %s18_s13 = int_to_ptr.vmem [resolvable:$true] %s17_s13 }
   0x4   :  { %s135_s14 = scalar_lea.vmem %s18_s13, 192  ;;  %p140_p1 = scmp.lt.s32.totalorder %s18_s13, %s18_s13 }
   0x5   :  { %p136_p0 = scmp.ne.s32.totalorder %s18_s13, %s135_s14  ;;  %p141_p2 = scmp.lt.s32.totalorder %s135_s14, %s135_s14 }
   0x7   :  { %p142_p3 = por %p141_p2, %p140_p1 }
   0x9   :  { %p143_p4 = pnand %p142_p3, %p136_p0 }
   0xb   :  { %146 = shalt.err (!%p143_p4)
}
   0xc   :  { %s214_s15 = smov 32   ;;  %s215_s16 = smov 2  }
   0xd   :  { %23 = dma.hbm_to_vmem [thread:$0]  %s263_s0, 192, %s18_s13, [#allocation3], %s214_s15, %s214_s15, %s215_s16  }
   0xe   :  { %207 = dma.done.wait [#allocation3], 192  }
   0xf   :  { %208 = vsyncadd [#allocation3], 4294967104  ;;  %v27_v0 = vld [vmem:[#allocation2] sm:$0x3]  ;;  %v28_v1 = vld [vmem:[#allocation2 + $0x2] sm:$0x3] }
  0x10   :  { %v29_v2 = vld [vmem:[#allocation2 + $0x4] sm:$0x3]  ;;  %v33_v3 = vmul.f32 0.299, %v27_v0  ;;  %v35_v4 = vmul.f32 0.587, %v28_v1 }
  0x11   :  { %v39_v5 = vmul.f32 0.114, %v29_v2  ;;  %v30_v6 = vld [vmem:[#allocation2 + $0x6] sm:$0x3]  ;;  %v31_v7 = vld [vmem:[#allocation2 + $0x8] sm:$0x3] }
  0x12   :  { %v32_v8 = vld [vmem:[#allocation2 + $0xa] sm:$0x3]  ;;  %v37_v9 = vadd.f32 %v35_v4, %v33_v3  ;;  %v34_v10 = vmul.f32 0.299, %v30_v6  ;;  %v36_v11 = vmul.f32 0.587, %v31_v7 }
  0x13   :  { %v40_v12 = vmul.f32 0.114, %v32_v8  ;;  %s216_s0 = smov [#allocation5]   ;;  %s217_s20 = smov [#allocation6]  }
  0x14   :  { %v41_v13 = vadd.f32 %v39_v5, %v37_v9  ;;  %v38_v14 = vadd.f32 %v36_v11, %v34_v10  ;;  %s78_s19 = sshll.u32 %s216_s0, 4  ;;  %s90_s21 = sshll.u32 %s217_s20, 4  ;;  %s79_s19 = int_to_ptr.vmem [resolvable:$true] %s78_s19  ;;  %s91_s21 = int_to_ptr.vmem [resolvable:$true] %s90_s21 }
  0x15   :  { %s147_s22 = scalar_lea.vmem %s79_s19, 64  ;;  %p152_p6 = scmp.lt.s32.totalorder %s79_s19, %s79_s19 }
  0x16   :  { %v43_v15 = vsub.f32 %v27_v0, %v41_v13  ;;  %v42_v16 = vadd.f32 %v40_v12, %v38_v14  ;;  %v55_v17 = vmax.f32 %v41_v13, 0.0  ;;  %v49_v18 = vsub.f32 %v29_v2, %v41_v13  ;;  %p148_p5 = scmp.ne.s32.totalorder %s79_s19, %s147_s22  ;;  %p153_p7 = scmp.lt.s32.totalorder %s147_s22, %s147_s22 }
  0x18   :  { %v45_v19 = vmul.f32 0.713, %v43_v15  ;;  %v44_v20 = vsub.f32 %v30_v6, %v42_v16  ;;  %v57_v21 = vmin.f32 %v55_v17, 1.0  ;;  %v56_v22 = vmax.f32 %v42_v16, 0.0  ;;  %p154_p8 = por %p153_p7, %p152_p6 }
  0x19   :  { %v51_v23 = vmul.f32 0.5256, %v49_v18  ;;  %v50_v24 = vsub.f32 %v32_v8, %v42_v16 }
  0x1a   :  { %v47_v25 = vadd.f32 0.5, %v45_v19  ;;  %v46_v26 = vmul.f32 0.713, %v44_v20  ;;  %59 = vst [vmem:[#allocation5] sm:$0x3] %v57_v21  ;;  %v58_v27 = vmin.f32 %v56_v22, 1.0  ;;  %p155_p9 = pnand %p154_p8, %p148_p5 }
  0x1b   :  { %v53_v28 = vadd.f32 0.5, %v51_v23  ;;  %v52_v29 = vmul.f32 0.5256, %v50_v24 }
  0x1c   :  { %v61_v30 = vmax.f32 %v47_v25, 0.0  ;;  %v48_v31 = vadd.f32 0.5, %v46_v26  ;;  %60 = vst [vmem:[#allocation5 + $0x2] sm:$0x3] %v58_v27 }
  0x1d   :  { %v67_v32 = vmax.f32 %v53_v28, 0.0  ;;  %v54_v33 = vadd.f32 0.5, %v52_v29 }
  0x1e   :  { %158 = shalt.err (!%p155_p9)
}
  0x1f   :  { %84 = dma.vmem_to_hbm [thread:$0]  %s79_s19, 64, %s264_s1, [#allocation4], %s214_s15, %s214_s15, %s215_s16   ;;  %v63_v34 = vmin.f32 %v61_v30, 1.0  ;;  %v62_v35 = vmax.f32 %v48_v31, 0.0  ;;  %v69_v36 = vmin.f32 %v67_v32, 1.0  ;;  %v68_v37 = vmax.f32 %v54_v33, 0.0 }
  0x20   :  { %s218_s25 = smov [#allocation8]   ;;  %s167_s27 = scalar_lea.vmem %s91_s21, 64 }
  0x21   :  { %s102_s26 = sshll.u32 %s218_s25, 4  ;;  %65 = vst [vmem:[#allocation6] sm:$0x3] %v63_v34  ;;  %v64_v38 = vmin.f32 %v62_v35, 1.0  ;;  %71 = vst [vmem:[#allocation8] sm:$0x3] %v69_v36  ;;  %p168_p10 = scmp.ne.s32.totalorder %s91_s21, %s167_s27  ;;  %s103_s26 = int_to_ptr.vmem [resolvable:$true] %s102_s26 }
  0x22   :  { %v70_v39 = vmin.f32 %v68_v37, 1.0  ;;  %p172_p11 = scmp.lt.s32.totalorder %s91_s21, %s91_s21  ;;  %p173_p12 = scmp.lt.s32.totalorder %s167_s27, %s167_s27 }
  0x23   :  { %66 = vst [vmem:[#allocation6 + $0x2] sm:$0x3] %v64_v38 }
  0x24   :  { %72 = vst [vmem:[#allocation8 + $0x2] sm:$0x3] %v70_v39  ;;  %p174_p13 = por %p173_p12, %p172_p11 }
  0x26   :  { %p175_p0 = pnand %p174_p13, %p168_p10 }
  0x28   :  { %178 = shalt.err (!%p175_p0)
}
  0x29   :  { %96 = dma.vmem_to_hbm [thread:$0]  %s91_s21, 64, %s265_s2, [#allocation7], %s214_s15, %s214_s15, %s215_s16  }
  0x2a   :  { %s187_s29 = scalar_lea.vmem %s103_s26, 64  ;;  %p192_p2 = scmp.lt.s32.totalorder %s103_s26, %s103_s26 }
  0x2b   :  { %p188_p1 = scmp.ne.s32.totalorder %s103_s26, %s187_s29  ;;  %p193_p3 = scmp.lt.s32.totalorder %s187_s29, %s187_s29 }
  0x2d   :  { %p194_p4 = por %p193_p3, %p192_p2 }
  0x2f   :  { %p195_p5 = pnand %p194_p4, %p188_p1 }
  0x31   :  { %198 = shalt.err (!%p195_p5)
}
  0x32   :  { %108 = dma.vmem_to_hbm [thread:$0]  %s103_s26, 64, %s266_s3, [#allocation7], %s214_s15, %s214_s15, %s215_s16  }
  0x33   :  { %209 = dma.done.wait [#allocation4], 64  }
  0x34   :  { %210 = vsyncadd [#allocation4], 4294967232 }
  0x35   :  { %211 = dma.done.wait [#allocation7], 128  }
  0x36   :  { %212 = vsyncadd [#allocation7], 4294967168 }
  0x37   :  { %118 = vsyncpa [#allocation3], 1 }
  0x38   :  { %119 = vsyncpa [#allocation4], 1 }
  0x39   :  { %120 = vsyncpa [#allocation7], 1 }

</bundles_post_ra>
